<compile_context>
chip_gen: v5e
topology: v5e:2x2
jax: 0.10.0
libtpu: 0.0.40
codegen_flags: <defaults>
</compile_context>

<pallas_src>
import jax
import jax.numpy as jnp
from jax.experimental import pallas as pl
from jax.experimental.pallas import tpu as pltpu


def _glu_kernel(a_ref, b_ref, o_ref):
    # out = a * sigmoid(b); sigmoid math in f32 (exp lands on the EUP), cast
    # back to the I/O dtype. Compute is fully hidden under the HBM stream.
    a = a_ref[...].astype(jnp.float32)
    b = b_ref[...].astype(jnp.float32)
    sig = 1.0 / (1.0 + jnp.exp(-b))
    o_ref[...] = (a * sig).astype(o_ref.dtype)


def _choose_lane_layout(K):
    """Factor K = R * L with L a large multiple of 128 (lane-dense last dim)."""
    for L in (4096, 2048, 1024, 512, 384, 256, 128):
        if K % L == 0:
            return K // L, L
    # K not a multiple of 128: fall back to a single full-extent row per
    # (batch, half). Correct (masked partial stores), just not lane-optimal.
    # TODO(synk): pad the lane axis to a multiple of 128 for odd nc*H*W sizes.
    return 1, K


def glu(x):
    """GLU over the channel dim of an NCHW tensor: x[:, :nc] * sigmoid(x[:, nc:])."""
    B, C, H, W = x.shape
    assert C % 2 == 0, "channels dont divide 2!"
    nc = C // 2
    K = nc * H * W                        # elements per (batch, half)
    itemsize = jnp.dtype(x.dtype).itemsize

    R, L = _choose_lane_layout(K)

    # Free reshape of the contiguous NCHW tensor: dim 1 separates the linear
    # part (index 0) from the gate (index 1). No data movement, no split copy.
    xv = x.reshape(B, 2, R, L)

    # Row tile targeting ~2 MiB per block per buffer.
    target_block_bytes = 2 * 1024 * 1024
    TR = max(1, target_block_bytes // (L * itemsize))
    if TR >= R:
        TR = R                             # full extent along rows (always legal)
    else:
        TR = max(8, (TR // 8) * 8)         # keep sublane dim a multiple of 8

    grid = (B, pl.cdiv(R, TR))

    out = pl.pallas_call(
        _glu_kernel,
        out_shape=jax.ShapeDtypeStruct((B, R, L), x.dtype),
        grid=grid,
        in_specs=[
            # half 0 -> 'a' (linear part)
            pl.BlockSpec((None, None, TR, L), lambda i, r: (i, 0, r, 0)),
            # half 1 -> 'b' (sigmoid gate)
            pl.BlockSpec((None, None, TR, L), lambda i, r: (i, 1, r, 0)),
        ],
        out_specs=pl.BlockSpec((None, TR, L), lambda i, r: (i, r, 0)),
        compiler_params=pltpu.CompilerParams(
            dimension_semantics=("parallel", "parallel"),
        ),
        cost_estimate=pl.CostEstimate(
            flops=3 * B * K,               # neg + add + mul per element (approx)
            transcendentals=B * K,         # one exp per element
            bytes_accessed=3 * B * K * itemsize,
        ),
    )(xv, xv)

    return out.reshape(B, nc, H, W)


if __name__ == "__main__":
    key = jax.random.PRNGKey(0)
    # Small NCHW input consistent with the module's forward (C must be even).
    x = jax.random.normal(key, (2, 4, 16, 16), dtype=jnp.float32)

    y = jax.jit(glu)(x)
    y = jax.block_until_ready(y)

    # Reference check (plain JAX), mirrors the PyTorch forward exactly.
    nc = x.shape[1] // 2
    y_ref = x[:, :nc] * jax.nn.sigmoid(x[:, nc:])
    assert y.shape == (2, 2, 16, 16)
    assert jnp.allclose(y, y_ref, atol=1e-6, rtol=1e-6)

    print("KERNEL_OK")
</pallas_src>

<mosaic_0001>
module attributes {stable_mosaic.version = 11 : i64} {
  func.func @_glu_kernel(%arg0: i32, %arg1: i32, %arg2: memref<1x1x1x512xf32, #tpu.memory_space<vmem>>, %arg3: memref<1x1x1x512xf32, #tpu.memory_space<vmem>>, %arg4: memref<1x1x512xf32, #tpu.memory_space<vmem>>) attributes {dimension_semantics = [#tpu.dimension_semantics<parallel>, #tpu.dimension_semantics<parallel>], iteration_bounds = array<i64: 2, 1>, scalar_prefetch = 0 : i64, scratch_operands = 0 : i64, tpu.core_type = #tpu.core_type<tc>, window_params = [{transform_indices = @transform_0, window_bounds = array<i64: 1, 1, 1, 512>}, {transform_indices = @transform_1, window_bounds = array<i64: 1, 1, 1, 512>}, {transform_indices = @transform_2, window_bounds = array<i64: 1, 1, 512>}]} {
    %c0 = arith.constant 0 : index
    %c0_0 = arith.constant 0 : index
    %c0_1 = arith.constant 0 : index
    %c0_2 = arith.constant 0 : index
    %0 = vector.load %arg2[%c0, %c0_0, %c0_1, %c0_2] : memref<1x1x1x512xf32, #tpu.memory_space<vmem>>, vector<1x1x1x512xf32>
    %1 = vector.shape_cast %0 : vector<1x1x1x512xf32> to vector<1x512xf32>
    %c0_3 = arith.constant 0 : index
    %c0_4 = arith.constant 0 : index
    %c0_5 = arith.constant 0 : index
    %c0_6 = arith.constant 0 : index
    %2 = vector.load %arg3[%c0_3, %c0_4, %c0_5, %c0_6] : memref<1x1x1x512xf32, #tpu.memory_space<vmem>>, vector<1x1x1x512xf32>
    %3 = vector.shape_cast %2 : vector<1x1x1x512xf32> to vector<1x512xf32>
    %cst = arith.constant 0.000000e+00 : f32
    %4 = vector.broadcast %cst : f32 to vector<1x512xf32>
    %5 = arith.subf %4, %3 : vector<1x512xf32>
    %6 = math.exp %5 : vector<1x512xf32>
    %cst_7 = arith.constant 1.000000e+00 : f32
    %7 = vector.broadcast %cst_7 : f32 to vector<1x512xf32>
    %8 = arith.addf %7, %6 : vector<1x512xf32>
    %cst_8 = arith.constant 1.000000e+00 : f32
    %9 = vector.broadcast %cst_8 : f32 to vector<1x512xf32>
    %10 = arith.divf %9, %8 : vector<1x512xf32>
    %11 = arith.mulf %1, %10 : vector<1x512xf32>
    %c0_9 = arith.constant 0 : index
    %c0_10 = arith.constant 0 : index
    %c0_11 = arith.constant 0 : index
    %12 = vector.load %arg4[%c0_9, %c0_10, %c0_11] : memref<1x1x512xf32, #tpu.memory_space<vmem>>, vector<1x1x512xf32>
    %13 = vector.shape_cast %12 : vector<1x1x512xf32> to vector<1x512xf32>
    %14 = vector.shape_cast %11 : vector<1x512xf32> to vector<1x1x512xf32>
    tpu.vector_store %arg4[%c0_9, %c0_10, %c0_11], %14 {strides = array<i32>} : memref<1x1x512xf32, #tpu.memory_space<vmem>>, vector<1x1x512xf32>,
    return
  }
  func.func @transform_0(%arg0: i32, %arg1: i32) -> (i32, i32, i32, i32) {
    %c0_i32 = arith.constant 0 : i32
    %c0_i32_0 = arith.constant 0 : i32
    %c0_i32_1 = arith.constant 0 : i32
    return %arg0, %c0_i32, %arg1, %c0_i32_0 : i32, i32, i32, i32
  }
  func.func @transform_1(%arg0: i32, %arg1: i32) -> (i32, i32, i32, i32) {
    %c1_i32 = arith.constant 1 : i32
    %c0_i32 = arith.constant 0 : i32
    %c0_i32_0 = arith.constant 0 : i32
    return %arg0, %c1_i32, %arg1, %c0_i32 : i32, i32, i32, i32
  }
  func.func @transform_2(%arg0: i32, %arg1: i32) -> (i32, i32, i32) {
    %c0_i32 = arith.constant 0 : i32
    %c0_i32_0 = arith.constant 0 : i32
    return %arg0, %arg1, %c0_i32 : i32, i32, i32
  }
}

</mosaic_0001>

<bundles_post_ra>
// kernel: glu.1
= control target key start
LH: loop header
LB: loop body
LE: loop exit
PB: predicated region body
PF: predicated region fallthrough
CT: control target
= control target key end

     0   :  { %s418_s9 = smov 0   ;;  %s420_s10 = smov 0   ;;  %s454_s0 = inlined_call_operand.vmem [shape: f32[2,2,1,512], index: 0, kind: input, shape index: {}, may-alias: {0,1}]   ;;  %s455_s1 = inlined_call_operand.vmem [shape: f32[2,2,1,512], index: 1, kind: input, shape index: {}, may-alias: {0,1}]   ;;  %s456_s2 = inlined_call_operand.vmem [shape: f32[2,1,512], index: 2, kind: output, shape index: {}]  }
   0x1   :  { %s422_s11 = smov 0  }
   0x2 LB: > { %s24_s12 = sadd.s32 1, %s397_s10  ;;  %p344_p0 = scmp.ge.s32.totalorder %s401_s11, 1  ;;  %s401_s11 = sphi %s422_s11, %s12_s11   ;;  %s397_s10 = sphi %s420_s10, %s458_s10   ;;  %s393_s9 = sphi %s418_s9, %s457_s9  }
   0x3   : > { %p26_p1 = scmp.ge.s32.totalorder %s24_s12, 2  ;;  %p147_p2 = scmp.lt.s32.totalorder %s401_s11, 3 }
   0x5   : > { %s460_s12 = smov (%p26_p1, %s24_s12), 0  ;;  %p148_p3 = pnand %p344_p0, %p147_p2 }
   0x6   : > { %p184_p4 = scmp.lt.s32.totalorder (!%p148_p3), %s393_s9, 1 }
   0x7   : > { %151 = sbr.rel (%p148_p3) target bundleno = 49 (0x31), region = 28 }
   0xc   : > { %s462_s9 = smov (!%p184_p4, %s393_s9), 1  ;;  %v231_v12 = vlaneseq }
   0xd   : > { %s345_s13 = sshll.u32 %s462_s9, 3  ;;  %s347_s20 = sshll.u32 %s462_s9, 2 }
   0xe   : > { %s292_s16 = scalar_lea.vmem %s455_s1, %s345_s13  ;;  %s191_s19 = scalar_lea.vmem %s454_s0, %s345_s13  ;;  %vm233_vm4 = vcmp.lt.s32.totalorder %v231_v12, 512 }
   0xf   : > { %v348_v0 = vld [vmem:[%s292_s16 + $0x4] sm:$0xf]  ;;  %v209_v14 = vld [vmem:[%s191_s19] sm:$0xf]  ;;  %s208_s23 = scalar_lea.vmem %s456_s2, %s347_s20 }
  0x10   : > { %v211_v1 = vsub.f32 0.0, %v348_v0 }
  0x12   : > { %v212_v2 = vmul.f32 1.442695, %v211_v1 }
  0x14   : > { %375 = vpow2.f32 %v212_v2 }
  0x1a   : > { %v376_v3 = vpop.eup %375 }
  0x1b   : > { %v214_v4 = vadd.f32 1.0, %v376_v3 }
  0x1d   : > { %377 = vrcp.f32 %v214_v4  ;;  %v226_v7 = vand.u32 2147483648, %v214_v4  ;;  %vm220_vm0 = vweird.f32 %v214_v4  ;;  %v224_v9 = vand.u32 2147483647, %v214_v4 }
  0x1f   : > { %v227_v11 = vor.u32 1.1754944e-38, %v226_v7  ;;  %vm225_vm3 = vcmp.eq.f32.partialorder %v224_v9, 8.507059e+37 }
  0x23   : > { %v378_v5 = vpop.eup %377 }
  0x24   : > { %v216_v6 = vmul.f32 %v378_v5, %v214_v4  ;;  %vm221_vm1 = vweird.f32 %v378_v5 }
  0x25   : > { %vm222_vm2 = vmor %vm220_vm0, %vm221_vm1 }
  0x26   : > { %v217_v8 = vsub.f32 1.0, %v216_v6 }
  0x28   : > { %v218_v10 = vmul.f32 %v378_v5, %v217_v8 }
  0x2a   : > { %v219_v13 = vadd.f32 %v378_v5, %v218_v10 }
  0x2c   : > { %v223_v15 = vsel %vm222_vm2, %v378_v5, %v219_v13 }
  0x2d   : > { %v228_v16 = vsel %vm225_vm3, %v227_v11, %v223_v15 }
  0x2e   : > { %v230_v17 = vmul.f32 %v228_v16, %v209_v14 }
  0x30   : > { %235 = vst.msk [vmem:[%s208_s23] sm:$0xf] %vm233_vm4, %v230_v17 }
  0x31 PF: > { %s12_s11 = sadd.s32 1, %s401_s11   ;;  %s457_s9 = smov %s397_s10 }
  0x32   : > { %p9_p5 = scmp.ge.s32.totalorder %s12_s11, 4   ;;  %s458_s10 = smov %s460_s12 }
  0x34   :  { %11 = sbr.rel (!%p9_p5) target bundleno = 2 (0x2), region = 61 }

</bundles_post_ra>
